<compile_context>
chip_gen: v6e
topology: v6e:2x2x1
jax: 0.10.0
libtpu: 0.0.40
codegen_flags: <defaults>
</compile_context>

<pallas_src>
import jax
import jax.numpy as jnp
from jax.experimental import pallas as pl
from jax.experimental.pallas import tpu as pltpu


def _mol_desc_embed_kernel(sm_ref, emb_ref, out_ref):
    # sm_ref : (TR, 2) f32 -- column 0: descriptor, column 1: mask (1.0/0.0)
    # emb_ref: (TR, H)     -- embeddings (f32 or bf16)
    # out_ref: (TR, H)     -- promoted output dtype
    sm = sm_ref[...]
    desc = sm[:, 0:1]                       # (TR, 1) f32
    keep = sm[:, 1:2] != 0.0                # (TR, 1) bool
    prod = emb_ref[...] * desc              # promotes to f32, lane-broadcast
    out_ref[...] = jnp.where(keep, prod, 0.0).astype(out_ref.dtype)


def _device_kind():
    try:
        return jax.devices()[0].device_kind.lower()
    except Exception:
        return ""


def _vmem_budget_bytes():
    """Per-generation scoped-VMEM limit to request (None = keep default)."""
    kind = _device_kind()
    if "v7" in kind or "7x" in kind:
        return 48 << 20   # 64 MiB/TC physical -> keep live pipeline <= ~40 MiB
    if "v6" in kind:
        return 80 << 20   # 128 MiB physical -> ~12-18 MiB emb blocks
    if "v5" in kind:
        return 48 << 20   # raise above the 16 MiB default scoped limit
    return None           # unknown chip: stay under the default scoped limit


def _choose_row_tile(n_rows, h, emb_itemsize, out_itemsize):
    """Pick the row tile from an explicit live-VMEM budget."""
    vmem_limit = _vmem_budget_bytes()
    usable = (vmem_limit - (8 << 20)) if vmem_limit is not None else (10 << 20)

    h_pad = ((h + 127) // 128) * 128
    # Live bytes per row of the double-buffered pipeline:
    #   2 x emb block + 2 x out block + 2 x (tr,2) f32 block lane-padded to 128.
    per_row = 2 * (h_pad * emb_itemsize + h_pad * out_itemsize + 128 * 4)
    tr = max(1, usable // per_row)
    tr = min(tr, n_rows)

    # Dtype-aware sublane rounding (8 for 4B, 16 for 2B, 32 for 1B dtypes).
    min_isize = min(emb_itemsize, out_itemsize)
    sub = {4: 8, 2: 16, 1: 32}.get(min_isize, 8)
    if tr < n_rows:
        tr = max(sub, (tr // sub) * sub)
    return tr, vmem_limit


def _reference(input_embeddings, mol_desc_mask, mol_descriptors):
    """Plain-JAX reference with the exact torch semantics."""
    out_dtype = jnp.promote_types(input_embeddings.dtype, mol_descriptors.dtype)
    prod = (input_embeddings.astype(out_dtype)
            * mol_descriptors[..., None].astype(out_dtype))
    return jnp.where(mol_desc_mask[..., None], prod, jnp.zeros((), out_dtype))


def mol_descriptor_embedder(input_embeddings, mol_desc_mask, mol_descriptors,
                            *, row_tile=None):
    """input_embeddings: [B, S, H] float
    mol_desc_mask:     [B, S] bool
    mol_descriptors:   [B, S] float
    returns:           [B, S, H], dtype = promote(emb, desc)  (torch parity)
    """
    B, S, H = input_embeddings.shape
    N = B * S
    out_dtype = jnp.promote_types(input_embeddings.dtype, mol_descriptors.dtype)

    if H % 128 != 0:
        # Lane-sparse output stores (masked vst) waste most of every vreg; for
        # such H a Pallas kernel is worse than the XLA elementwise fusion.
        return _reference(input_embeddings, mol_desc_mask, mol_descriptors)

    emb2d = input_embeddings.reshape(N, H)
    # Pack descriptor + mask into one narrow f32 side stream (one DMA, one
    # lane-padded VMEM buffer instead of two).
    scale_mask = jnp.stack(
        [mol_descriptors.reshape(N).astype(jnp.float32),
         mol_desc_mask.reshape(N).astype(jnp.float32)],
        axis=-1)  # (N, 2) f32

    emb_isize = jnp.dtype(input_embeddings.dtype).itemsize
    out_isize = jnp.dtype(out_dtype).itemsize
    tr_auto, vmem_limit = _choose_row_tile(N, H, emb_isize, out_isize)
    tr = tr_auto if row_tile is None else min(row_tile, N)

    grid = (pl.cdiv(N, tr),)

    cp_kwargs = dict(dimension_semantics=("parallel",))
    if vmem_limit is not None:
        cp_kwargs["vmem_limit_bytes"] = int(vmem_limit)

    cost = pl.CostEstimate(
        flops=2 * N * H,                                   # mul + select
        transcendentals=0,
        bytes_accessed=N * H * (emb_isize + out_isize) + N * 8,
    )

    out2d = pl.pallas_call(
        _mol_desc_embed_kernel,
        out_shape=jax.ShapeDtypeStruct((N, H), out_dtype),
        grid=grid,
        in_specs=[
            pl.BlockSpec((tr, 2), lambda i: (i, 0)),   # packed desc + mask
            pl.BlockSpec((tr, H), lambda i: (i, 0)),   # embeddings
        ],
        out_specs=pl.BlockSpec((tr, H), lambda i: (i, 0)),
        compiler_params=pltpu.CompilerParams(**cp_kwargs),
        cost_estimate=cost,
    )(scale_mask, emb2d)

    return out2d.reshape(B, S, H)


if __name__ == "__main__":
    key = jax.random.PRNGKey(0)
    k1, k2, k3 = jax.random.split(key, 3)

    # --- Test 1: lane-dense Pallas path (H multiple of 128), single block,
    #             including the non-finite edge case at a masked position.
    B, S, H = 2, 8, 128
    emb = jax.random.normal(k1, (B, S, H), dtype=jnp.float32)
    mask = jax.random.bernoulli(k2, p=0.5, shape=(B, S))
    desc = jax.random.normal(k3, (B, S), dtype=jnp.float32)
    emb = emb.at[0, 0, :].set(jnp.nan)      # NaN embedding ...
    mask = mask.at[0, 0].set(False)         # ... at a masked-out position -> 0
    out = jax.block_until_ready(mol_descriptor_embedder(emb, mask, desc))
    ref = _reference(emb, mask, desc)
    assert out.shape == ref.shape and out.dtype == ref.dtype
    assert jnp.allclose(out, ref, atol=1e-6), "test1 mismatch"

    # --- Test 2: ragged tail (N % tr != 0) through the Pallas path.
    B2, S2 = 2, 10   # N = 20, row_tile = 8 -> 3 grid steps, masked tail
    emb2 = jax.random.normal(k1, (B2, S2, H), dtype=jnp.float32)
    mask2 = jax.random.bernoulli(k2, p=0.4, shape=(B2, S2))
    desc2 = jax.random.normal(k3, (B2, S2), dtype=jnp.float32)
    out2 = jax.block_until_ready(
        mol_descriptor_embedder(emb2, mask2, desc2, row_tile=8))
    assert jnp.allclose(out2, _reference(emb2, mask2, desc2), atol=1e-6), \
        "test2 mismatch"

    # --- Test 3: bf16 embeddings with f32 descriptors (promoted f32 output).
    emb3 = jax.random.normal(k1, (B2, S2, H), dtype=jnp.bfloat16)
    out3 = jax.block_until_ready(
        mol_descriptor_embedder(emb3, mask2, desc2, row_tile=16))
    assert out3.dtype == jnp.float32
    assert jnp.allclose(out3, _reference(emb3, mask2, desc2), atol=1e-6), \
        "test3 mismatch"

    # --- Test 4: H not a multiple of 128 -> fused jnp fallback path.
    B4, S4, H4 = 2, 8, 32
    emb4 = jax.random.normal(k1, (B4, S4, H4), dtype=jnp.float32)
    mask4 = jax.random.bernoulli(k2, p=0.5, shape=(B4, S4))
    desc4 = jax.random.normal(k3, (B4, S4), dtype=jnp.float32)
    out4 = jax.block_until_ready(mol_descriptor_embedder(emb4, mask4, desc4))
    assert jnp.allclose(out4, _reference(emb4, mask4, desc4), atol=1e-6), \
        "test4 mismatch"

    print("KERNEL_OK")
</pallas_src>

<mosaic_0001>
module attributes {stable_mosaic.version = 11 : i64} {
  func.func @_mol_desc_embed_kernel(%arg0: i32, %arg1: memref<16x2xf32, #tpu.memory_space<vmem>>, %arg2: memref<16x128xf32, #tpu.memory_space<vmem>>, %arg3: memref<16x128xf32, #tpu.memory_space<vmem>>) attributes {dimension_semantics = [#tpu.dimension_semantics<parallel>], iteration_bounds = array<i64: 1>, scalar_prefetch = 0 : i64, scratch_operands = 0 : i64, tpu.core_type = #tpu.core_type<tc>, window_params = [{transform_indices = @transform_0, window_bounds = array<i64: 16, 2>}, {transform_indices = @transform_1, window_bounds = array<i64: 16, 128>}, {transform_indices = @transform_2, window_bounds = array<i64: 16, 128>}]} {
    %c0 = arith.constant 0 : index
    %c0_0 = arith.constant 0 : index
    %0 = vector.load %arg1[%c0, %c0_0] : memref<16x2xf32, #tpu.memory_space<vmem>>, vector<16x2xf32>
    %1 = vector.extract_strided_slice %0 {offsets = [0, 0], sizes = [16, 1], strides = [1, 1]} : vector<16x2xf32> to vector<16x1xf32>
    %2 = vector.extract_strided_slice %0 {offsets = [0, 1], sizes = [16, 1], strides = [1, 1]} : vector<16x2xf32> to vector<16x1xf32>
    %cst = arith.constant 0.000000e+00 : f32
    %3 = vector.broadcast %cst : f32 to vector<16x1xf32>
    %4 = arith.cmpf one, %2, %3 : vector<16x1xf32>
    %c0_1 = arith.constant 0 : index
    %c0_2 = arith.constant 0 : index
    %5 = vector.load %arg2[%c0_1, %c0_2] : memref<16x128xf32, #tpu.memory_space<vmem>>, vector<16x128xf32>
    %6 = vector.broadcast %1 : vector<16x1xf32> to vector<16x128xf32>
    %7 = arith.mulf %5, %6 : vector<16x128xf32>
    %cst_3 = arith.constant 0.000000e+00 : f32
    %8 = vector.shape_cast %4 : vector<16x1xi1> to vector<16x1xi1>
    %9 = vector.broadcast %8 : vector<16x1xi1> to vector<16x128xi1>
    %10 = vector.broadcast %cst_3 : f32 to vector<16x128xf32>
    %11 = arith.select %9, %7, %10 : vector<16x128xi1>, vector<16x128xf32>
    %c0_4 = arith.constant 0 : index
    %c0_5 = arith.constant 0 : index
    %12 = vector.load %arg3[%c0_4, %c0_5] : memref<16x128xf32, #tpu.memory_space<vmem>>, vector<16x128xf32>
    tpu.vector_store %arg3[%c0_4, %c0_5], %11 {strides = array<i32>} : memref<16x128xf32, #tpu.memory_space<vmem>>, vector<16x128xf32>,
    return
  }
  func.func @transform_0(%arg0: i32) -> (i32, i32) {
    %c0_i32 = arith.constant 0 : i32
    %c0_i32_0 = arith.constant 0 : i32
    return %arg0, %c0_i32 : i32, i32
  }
  func.func @transform_1(%arg0: i32) -> (i32, i32) {
    %c0_i32 = arith.constant 0 : i32
    %c0_i32_0 = arith.constant 0 : i32
    return %arg0, %c0_i32 : i32, i32
  }
  func.func @transform_2(%arg0: i32) -> (i32, i32) {
    %c0_i32 = arith.constant 0 : i32
    %c0_i32_0 = arith.constant 0 : i32
    return %arg0, %c0_i32 : i32, i32
  }
}

</mosaic_0001>

<bundles_post_ra>
// kernel: tpu_custom_call.1
= control target key start
LH: loop header
LB: loop body
LE: loop exit
PB: predicated region body
PF: predicated region fallthrough
CT: control target
= control target key end

     0   :  { %v90_v2 = vmov 0   ;;  %v91_v3 = vmov 1   ;;  %s125_s0 = inlined_call_operand.vmem [shape: f32[16,2], index: 0, kind: input, shape index: {}]   ;;  %s126_s1 = inlined_call_operand.vmem [shape: f32[16,128], index: 1, kind: input, shape index: {}]   ;;  %s127_s2 = inlined_call_operand.hbm [shape: f32[16,128], index: 2, kind: output, shape index: {}]  }
   0x1   :  { %v12_v0 = vld [vmem:[%s125_s0] sm:$0xff]  ;;  %v13_v1 = vld [vmem:[%s125_s0 + $0x8] sm:$0xff]  ;;  %65 = vset.pattern.permute.xlu0 %v90_v2  ;;  %66 = vset.pattern.permute.xlu1 %v91_v3 }
   0x2   :  { %vm14_vm0 = vcmp.ne.f32.partialorder %v12_v0, 0.0  ;;  %vm15_vm1 = vcmp.ne.f32.partialorder %v13_v1, 0.0 }
   0x3   :  { %7 = vsyncpa [#allocation3], 0  ;;  %20 = vperm.xlu0 %65, %v12_v0   ;;  %v30_v4 = vsel %vm14_vm0, 1, %v90_v2  ;;  %v31_v5 = vsel %vm15_vm1, 1, %v90_v2  ;;  %v16_v6 = vld [vmem:[%s126_s1] sm:$0xff]  ;;  %v17_v10 = vld [vmem:[%s126_s1 + $0x8] sm:$0xff] }
   0x4   :  { %33 = vperm.xlu1 %66, %v30_v4   ;;  %s92_s16 = smov [#allocation2]  }
   0x5   :  { %s49_s17 = sshll.u32 %s92_s16, 4  ;;  %s50_s17 = int_to_ptr.vmem [resolvable:$true] %s49_s17 }
   0x6   :  { %s68_s18 = scalar_lea.vmem %s50_s17, 256  ;;  %p73_p1 = scmp.lt.s32.totalorder %s50_s17, %s50_s17 }
   0x7   :  { %25 = vperm.xlu0 %65, %v13_v1   ;;  %p69_p0 = scmp.ne.s32.totalorder %s50_s17, %s68_s18  ;;  %p74_p2 = scmp.lt.s32.totalorder %s68_s18, %s68_s18 }
   0x8   :  { %36 = vperm.xlu1 %66, %v31_v5  }
   0x9   :  { %p75_p3 = por %p74_p2, %p73_p1 }
   0xb   :  { %67 = vset.pattern.permute.xlu0 %v91_v3  ;;  %p76_p4 = pnand %p75_p3, %p69_p0 }
  0x7e   :  { %v21_v7 = vpop.permute.xlu0 %20 }
  0x7f   :  { %v28_v8 = vmul.f32 %v21_v7, %v16_v6  ;;  %v34_v9 = vpop.permute.xlu1 %33 }
  0x80   :  { %vm38_vm2 = vcmp.eq.s32.totalorder %v34_v9, 1 }
  0x81   :  { %v40_v11 = vsel %vm38_vm2, %v28_v8, 0.0 }
  0x82   :  { %42 = vst [vmem:[#allocation2] sm:$0xff] %v40_v11  ;;  %v26_v12 = vpop.permute.xlu0 %25 }
  0x83   :  { %v29_v13 = vmul.f32 %v26_v12, %v17_v10  ;;  %v37_v14 = vpop.permute.xlu1 %36 }
  0x84   :  { %vm39_vm3 = vcmp.eq.s32.totalorder %v37_v14, 1 }
  0x85   :  { %v41_v15 = vsel %vm39_vm3, %v29_v13, 0.0 }
  0x86   :  { %43 = vst [vmem:[#allocation2 + $0x8] sm:$0xff] %v41_v15 }
  0x87   :  { %79 = shalt.err (!%p76_p4)
}
  0x88   :  { %s93_s19 = smov 128   ;;  %s94_s1 = smov 8  }
  0x89   :  { %55 = dma.vmem_to_hbm [thread:$0]  %s50_s17, 256, %s127_s2, [#allocation3], %s93_s19, %s93_s19, %s94_s1  }
  0x8a   :  { %88 = dma.done.wait [#allocation3], 256  }
  0x8b   :  { %89 = vsyncadd [#allocation3], 4294967040 }
  0x8c   :  { %59 = vsyncpa [#allocation3], 1 }

</bundles_post_ra>
